<compile_context>
chip_gen: v7x
topology: tpu7x:2x2x1
jax: 0.10.0
libtpu: 0.0.40
codegen_flags: <defaults>
</compile_context>

<pallas_src>
import jax
import jax.numpy as jnp
from jax import lax
from jax.experimental import pallas as pl
from jax.experimental.pallas import tpu as pltpu


def maxpool2_kernel(x_ref, o_ref):
    # x_ref: (TB, TH, W) block of TB planes.
    # o_ref: (TB, TH//2, W//2)  or lane-dense (TB, (TH//2)*(W//2)).
    tb, th, w = x_ref.shape
    th2, w2 = th // 2, w // 2

    # 1) H (sublane) pooling via strided ref loads: rows 0,2,4,... vs 1,3,5,...
    #    Avoids the sublane-2 reshape relayout; th//2 is a sublane multiple by
    #    construction (_pick_tiles row quantum), so loads stay tile-aligned.
    a = x_ref[:, pl.ds(0, th2, stride=2), :]
    b = x_ref[:, pl.ds(1, th2, stride=2), :]
    xh = jnp.maximum(a, b)                                  # (TB, TH//2, W)

    # 2) W (lane) pooling on the already-halved data (pair-max along lanes).
    xw = jnp.max(xh.reshape(tb * th2, w2, 2), axis=2)       # (TB*TH//2, W//2)

    if len(o_ref.shape) == 2:
        # Lane-dense flattened output slab.
        o_ref[...] = xw.reshape(tb, th2 * w2)
    else:
        o_ref[...] = xw.reshape(tb, th2, w2)


def _num_tensorcores():
    """2 on v7x (grid axes shard across TCs), 1 on v5e/v6e. Best-effort."""
    try:
        kind = jax.devices()[0].device_kind.lower()
        if "v7" in kind or "7x" in kind:
            return 2
    except Exception:
        pass
    return 1


def _vmem_budget_bytes():
    """~75% of physical VMEM; conservative 48 MiB fallback (75% of v7x 64 MiB)."""
    try:
        cap = getattr(pltpu.get_tpu_info(), "vmem_capacity_bytes", None)
        if cap:
            return int(cap) * 3 // 4
    except Exception:
        pass
    return 48 << 20


def _pick_tiles(nc, h, w, itemsize, target_bytes, num_cores):
    """Pick (tb planes, th rows) per block.

    ~target_bytes of input per block; th keeps the pooled output rows on full
    sublane tiles; on 2-TC chips keep >= 2 grid steps when possible.
    """
    # Input-row quantum so pooled output rows land on full native sublane
    # tiles: 16 for f32, 32 for bf16, 64 for int8.
    row_quant = {4: 16, 2: 32, 1: 64}.get(itemsize, 16)

    th = h
    if h * w * itemsize > target_bytes:
        best, cand = None, row_quant
        while cand <= h:
            if h % cand == 0 and cand * w * itemsize <= target_bytes:
                best = cand
            cand += row_quant
        if best is None and h % row_quant == 0:
            # No aligned divisor fits the soft budget: take the smallest
            # aligned tile instead of the whole plane (never blow VMEM).
            best = row_quant
        if best is not None:
            th = best

    block_bytes = th * w * itemsize
    tb = int(max(1, min(nc, target_bytes // max(block_bytes, 1))))
    while nc % tb:
        tb -= 1
    # Only split small grids for parallelism on chips with 2 TensorCores.
    if num_cores > 1 and (nc // tb) * (h // th) < num_cores and nc > 1:
        tb = max(d for d in range(1, nc // 2 + 1) if nc % d == 0)
    return tb, th, row_quant


def down(x, *, target_bytes=8 * 1024 * 1024):
    """MaxPool2d(kernel_size=2, stride=2) on an NCHW tensor."""
    N, C, H, W = x.shape
    assert H % 2 == 0 and W % 2 == 0, "MaxPool2d(2) needs even spatial dims"
    Ho, Wo = H // 2, W // 2
    NC = N * C
    itemsize = jnp.dtype(x.dtype).itemsize

    tb, th, row_quant = _pick_tiles(NC, H, W, itemsize, target_bytes,
                                    _num_tensorcores())
    th2 = th // 2
    grid = (NC // tb, H // th)

    # Lane-dense output slab when the pooled width is lane-sparse (< 128),
    # guarded so the flattened block still satisfies tiling constraints.
    sub_q = max(row_quant // 2, 8)
    lane_dense = (
        Wo < 128
        and (tb % sub_q == 0 or tb == NC)
        and (th == H or (th2 * Wo) % 128 == 0)
    )

    in_spec = pl.BlockSpec((tb, th, W), lambda i, j: (i, j, 0))
    if lane_dense:
        out_shape = jax.ShapeDtypeStruct((NC, Ho * Wo), x.dtype)
        out_spec = pl.BlockSpec((tb, th2 * Wo), lambda i, j: (i, j))
    else:
        out_shape = jax.ShapeDtypeStruct((NC, Ho, Wo), x.dtype)
        out_spec = pl.BlockSpec((tb, th2, Wo), lambda i, j: (i, j, 0))

    # Double-buffered in + out blocks; raise the scoped-VMEM limit once that
    # outgrows v5e's 16 MiB default, capped with headroom below physical VMEM.
    in_bytes = tb * th * W * itemsize
    out_bytes = tb * th2 * Wo * itemsize
    vmem_need = 2 * (in_bytes + out_bytes)
    vmem_limit = None
    if vmem_need > 12 * 1024 * 1024:
        vmem_limit = int(min(vmem_need + (4 << 20), _vmem_budget_bytes()))

    cost = pl.CostEstimate(
        flops=3 * NC * Ho * Wo,                   # 3 pairwise maxes per output
        transcendentals=0,
        bytes_accessed=NC * (H * W + Ho * Wo) * itemsize,
    )

    xf = x.reshape(NC, H, W)   # free: merges contiguous leading dims
    out = pl.pallas_call(
        maxpool2_kernel,
        out_shape=out_shape,
        grid=grid,
        in_specs=[in_spec],
        out_specs=out_spec,
        compiler_params=pltpu.CompilerParams(
            dimension_semantics=("parallel", "parallel"),
            vmem_limit_bytes=vmem_limit,
        ),
        cost_estimate=cost,
    )(xf)
    return out.reshape(N, C, Ho, Wo)


def _reference_maxpool(x):
    # Pure-JAX reference (matches torch.nn.MaxPool2d(2) for float inputs).
    return lax.reduce_window(
        x,
        -jnp.inf,
        lax.max,
        window_dimensions=(1, 1, 2, 2),
        window_strides=(1, 1, 2, 2),
        padding="VALID",
    )


if __name__ == "__main__":
    key = jax.random.PRNGKey(0)
    x = jax.random.normal(key, (2, 4, 16, 16), dtype=jnp.float32)

    out = down(x)
    out = jax.block_until_ready(out)

    ref = _reference_maxpool(x)
    assert out.shape == (2, 4, 8, 8), out.shape
    assert jnp.allclose(out, ref), "mismatch vs reference maxpool"

    print("KERNEL_OK")
</pallas_src>

<mosaic_0001>
module attributes {stable_mosaic.version = 11 : i64} {
  func.func @maxpool2_kernel(%arg0: i32, %arg1: i32, %arg2: memref<8x16x16xf32, #tpu.memory_space<vmem>>, %arg3: memref<8x64xf32, #tpu.memory_space<vmem>>) attributes {dimension_semantics = [#tpu.dimension_semantics<parallel>, #tpu.dimension_semantics<parallel>], iteration_bounds = array<i64: 1, 1>, scalar_prefetch = 0 : i64, scratch_operands = 0 : i64, tpu.core_type = #tpu.core_type<tc>, window_params = [{transform_indices = @transform_0, window_bounds = array<i64: 8, 16, 16>}, {transform_indices = @transform_1, window_bounds = array<i64: 8, 64>}]} {
    %c0 = arith.constant 0 : index
    %c0_0 = arith.constant 0 : index
    %c0_1 = arith.constant 0 : index
    %0 = tpu.strided_load %arg2[%c0, %c0_0, %c0_1] {strides = array<i32: 1, 2, 1>} : memref<8x16x16xf32, #tpu.memory_space<vmem>>, vector<8x8x16xf32>
    %c0_2 = arith.constant 0 : index
    %c1 = arith.constant 1 : index
    %c0_3 = arith.constant 0 : index
    %1 = tpu.strided_load %arg2[%c0_2, %c1, %c0_3] {strides = array<i32: 1, 2, 1>} : memref<8x16x16xf32, #tpu.memory_space<vmem>>, vector<8x8x16xf32>
    %2 = arith.maximumf %0, %1 : vector<8x8x16xf32>
    %3 = vector.shape_cast %2 : vector<8x8x16xf32> to vector<64x8x2xf32>
    %cst = arith.constant dense<0xFF800000> : vector<64x8xf32>
    %4 = vector.multi_reduction <maximumf>, %3, %cst [2] : vector<64x8x2xf32> to vector<64x8xf32>
    %5 = vector.shape_cast %4 : vector<64x8xf32> to vector<8x64xf32>
    %c0_4 = arith.constant 0 : index
    %c0_5 = arith.constant 0 : index
    %6 = vector.load %arg3[%c0_4, %c0_5] : memref<8x64xf32, #tpu.memory_space<vmem>>, vector<8x64xf32>
    tpu.vector_store %arg3[%c0_4, %c0_5], %5 {strides = array<i32>} : memref<8x64xf32, #tpu.memory_space<vmem>>, vector<8x64xf32>,
    return
  }
  func.func @transform_0(%arg0: i32, %arg1: i32) -> (i32, i32, i32) {
    %c0_i32 = arith.constant 0 : i32
    %c0_i32_0 = arith.constant 0 : i32
    return %arg0, %arg1, %c0_i32 : i32, i32, i32
  }
  func.func @transform_1(%arg0: i32, %arg1: i32) -> (i32, i32) {
    %c0_i32 = arith.constant 0 : i32
    return %arg0, %arg1 : i32, i32
  }
}

</mosaic_0001>

<bundles_post_ra>
// kernel: tpu_custom_call.1
= control target key start
LH: loop header
LB: loop body
LE: loop exit
PB: predicated region body
PF: predicated region fallthrough
CT: control target
= control target key end

     0   :  { %6 = vsyncpa [#allocation3], 0  ;;  %s3258_s0 = inlined_call_operand.hbm [shape: f32[8,16,16], index: 0, kind: input, shape index: {}]   ;;  %s3259_s1 = inlined_call_operand.hbm [shape: f32[8,64], index: 1, kind: output, shape index: {}]  }
   0x1   :  { %7 = vsyncpa [#allocation4], 0  ;;  %s2004_s6 = smov [#allocation2]   ;;  %s1956_s10 = scalar_lea.hbm %s3258_s0, 2048 }
   0x2   :  { %s13_s7 = sshll.u32 %s2004_s6, 4  ;;  %p1957_p0 = scmp.ne.s32.totalorder %s3258_s0, %s1956_s10  ;;  %s14_s7 = int_to_ptr.vmem [resolvable:$true] %s13_s7 }
   0x3   :  { %p1960_p1 = scmp.lt.u32.totalorder %s1956_s10, %s3258_s0 }
   0x5   :  { %p1962_p2 = pnand %p1960_p1, %p1957_p0 }
   0x7   :  { %1965 = shalt.err (!%p1962_p2)
}
   0x8   :  { %s1966_s15 = scalar_lea.vmem %s14_s7, 2048  ;;  %p1971_p4 = scmp.lt.s32.totalorder %s14_s7, %s14_s7 }
   0x9   :  { %p1967_p3 = scmp.ne.s32.totalorder %s14_s7, %s1966_s15  ;;  %p1972_p5 = scmp.lt.s32.totalorder %s1966_s15, %s1966_s15 }
   0xb   :  { %p1973_p6 = por %p1972_p5, %p1971_p4 }
   0xd   :  { %p1974_p7 = pnand %p1973_p6, %p1967_p3 }
   0xf   :  { %1977 = shalt.err (!%p1974_p7)
}
  0x10   :  { %s2005_s16 = smov 128   ;;  %s2006_s17 = smov 8  }
  0x11   :  { %19 = dma.hbm_to_vmem [thread:$0]  %s3258_s0, 2048, %s14_s7, [#allocation3], %s2005_s16, %s2005_s16, %s2006_s17  }
  0x12   :  { %2000 = dma.done.wait [#allocation3], 2048  }
  0x13   :  { %2001 = vsyncadd [#allocation3], 4294965248  ;;  %v27_v0 = vld [vmem:[#allocation2 + $0x20] ss:$2 sm:$0xff]  ;;  %v43_v1 = vld [vmem:[#allocation2 + $0x21] ss:$2 sm:$0xff]  ;;  %v3260_v54 = vlaneseq }
  0x14   :  { %v23_v2 = vld [vmem:[#allocation2] ss:$2 sm:$0xff]  ;;  %v2039_v3 = vmax.f32 %v27_v0, %v43_v1  ;;  %v39_v4 = vld [vmem:[#allocation2 + $0x1] ss:$2 sm:$0xff]  ;;  %v29_v5 = vld [vmem:[#allocation2 + $0x30] ss:$2 sm:$0xff] }
  0x15   :  { %v45_v6 = vld [vmem:[#allocation2 + $0x31] ss:$2 sm:$0xff]  ;;  %v2041_v7 = vmax.f32 %v23_v2, %v39_v4  ;;  %v25_v8 = vld [vmem:[#allocation2 + $0x10] ss:$2 sm:$0xff]  ;;  %s2007_s20 = smov 126   ;;  %s2008_s0 = smov 124  }
  0x16   :  { %v41_v9 = vld [vmem:[#allocation2 + $0x11] ss:$2 sm:$0xff]  ;;  %74 = vrot.lane.b32.xlu1 %v2039_v3, %s2007_s20  ;;  %v2044_v10 = vmax.f32 %v29_v5, %v45_v6  ;;  %v33_v12 = vld [vmem:[#allocation2 + $0x50] ss:$2 sm:$0xff]  ;;  %v31_v14 = vld [vmem:[#allocation2 + $0x40] ss:$2 sm:$0xff] }
  0x17   :  { %70 = vrot.lane.b32.xlu0 %v2041_v7, %s2007_s20  ;;  %v2047_v11 = vmax.f32 %v25_v8, %v41_v9  ;;  %v49_v13 = vld [vmem:[#allocation2 + $0x51] ss:$2 sm:$0xff]  ;;  %v47_v15 = vld [vmem:[#allocation2 + $0x41] ss:$2 sm:$0xff]  ;;  %v37_v18 = vld [vmem:[#allocation2 + $0x70] ss:$2 sm:$0xff] }
  0x18   :  { %v2050_v16 = vmax.f32 %v33_v12, %v49_v13  ;;  %v2053_v17 = vmax.f32 %v31_v14, %v47_v15  ;;  %v53_v19 = vld [vmem:[#allocation2 + $0x71] ss:$2 sm:$0xff]  ;;  %v35_v20 = vld [vmem:[#allocation2 + $0x60] ss:$2 sm:$0xff]  ;;  %v51_v21 = vld [vmem:[#allocation2 + $0x61] ss:$2 sm:$0xff] }
  0x19   :  { %v2056_v22 = vmax.f32 %v37_v18, %v53_v19  ;;  %v2059_v23 = vmax.f32 %v35_v20, %v51_v21  ;;  %s2009_s21 = smov 122   ;;  %s2010_s22 = smov 120   ;;  %v2014_v52 = vmov 1983009808   ;;  %v2015_v57 = vmov 1934713408  }
  0x1a   :  { %76 = vrot.lane.b32.xlu1 %v2044_v10, %s2007_s20  ;;  %s2011_s23 = smov 118   ;;  %s2012_s24 = smov 116   ;;  %v241_v53 = vunpack.c.l.s4 %v2014_v52  ;;  %v305_v58 = vunpack.c.l.s4 %v2015_v57  ;;  %v2162_v60 = vshrl.u32 %v3260_v54, 7  ;;  %vm1326_vm0 = vcmask 15360  }
  0x1b   :  { %72 = vrot.lane.b32.xlu0 %v2047_v11, %s2007_s20  ;;  %s2013_s25 = smov 114   ;;  %vm1594_vm1 = vcmask 130112   ;;  %vm1601_vm2 = vcmask 195712   ;;  %vm1608_vm3 = vcmask 261312   ;;  %vm1615_vm4 = vcmask 326912   ;;  %s2016_s26 = smov [#allocation5]  }
  0x1c   :  { %v242_v59 = vunpack.c.0.s8 %v241_v53  ;;  %3287 = vst [vmem:[#allocation8_spill] sm:$0xff] %v2162_v60  ;;  %v306_v63 = vunpack.c.0.s8 %v305_v58  ;;  %vm1622_vm5 = vcmask 392512   ;;  %vm1629_vm6 = vcmask 458112   ;;  %s1934_s27 = sshll.u32 %s2016_s26, 4  ;;  %s1935_s27 = int_to_ptr.vmem [resolvable:$true] %s1934_s27 }
  0x1d   :  { %vm1636_vm7 = vcmask 523712   ;;  %vm1911_vm8 = vcmask 1041409   ;;  %vm1913_vm9 = vcmask 1042434   ;;  %vm1915_vm10 = vcmask 1043459   ;;  %s1978_s28 = scalar_lea.vmem %s1935_s27, 128  ;;  %p1983_p9 = scmp.lt.s32.totalorder %s1935_s27, %s1935_s27 }
  0x1e   :  { %80 = vrot.lane.b32.xlu1 %v2050_v16, %s2007_s20  ;;  %v2171_v2 = vsub.s32 %v242_v59, %v2162_v60  ;;  %v2181_v12 = vsub.s32 %v306_v63, %v2162_v60  ;;  %vm1917_vm11 = vcmask 1044484   ;;  %vm1919_vm12 = vcmask 1045509   ;;  %p1979_p8 = scmp.ne.s32.totalorder %s1935_s27, %s1978_s28  ;;  %p1984_p10 = scmp.lt.s32.totalorder %s1978_s28, %s1978_s28 }
  0x1f   :  { %78 = vrot.lane.b32.xlu0 %v2053_v17, %s2007_s20  ;;  %vm1921_vm13 = vcmask 1046534   ;;  %vm1923_vm14 = vcmask 1047559   ;;  %vm1926_vm15 = vcmask 523264  }
  0x20   :  { %p1985_p11 = por %p1984_p10, %p1983_p9 }
  0x22   :  { %84 = vrot.lane.b32.xlu1 %v2056_v22, %s2007_s20  ;;  %p1986_p12 = pnand %p1985_p11, %p1979_p8 }
  0x23   :  { %82 = vrot.lane.b32.xlu0 %v2059_v23, %s2007_s20 }
  0x26   :  { %96 = vrot.lane.b32.xlu1 %v2047_v11, %s2008_s0 }
  0x27   :  { %94 = vrot.lane.b32.xlu0 %v2041_v7, %s2008_s0 }
  0x2a   :  { %100 = vrot.lane.b32.xlu1 %v2044_v10, %s2008_s0 }
  0x2b   :  { %98 = vrot.lane.b32.xlu0 %v2039_v3, %s2008_s0 }
  0x2e   :  { %104 = vrot.lane.b32.xlu1 %v2050_v16, %s2008_s0 }
  0x2f   :  { %102 = vrot.lane.b32.xlu0 %v2053_v17, %s2008_s0 }
  0x32   :  { %108 = vrot.lane.b32.xlu1 %v2056_v22, %s2008_s0 }
  0x33   :  { %106 = vrot.lane.b32.xlu0 %v2059_v23, %s2008_s0 }
  0x36   :  { %120 = vrot.lane.b32.xlu1 %v2047_v11, %s2009_s21 }
  0x37   :  { %118 = vrot.lane.b32.xlu0 %v2041_v7, %s2009_s21 }
  0x3a   :  { %124 = vrot.lane.b32.xlu1 %v2044_v10, %s2009_s21 }
  0x3b   :  { %122 = vrot.lane.b32.xlu0 %v2039_v3, %s2009_s21 }
  0x3e   :  { %128 = vrot.lane.b32.xlu1 %v2050_v16, %s2009_s21 }
  0x3f   :  { %126 = vrot.lane.b32.xlu0 %v2053_v17, %s2009_s21 }
  0x42   :  { %132 = vrot.lane.b32.xlu1 %v2056_v22, %s2009_s21 }
  0x43   :  { %130 = vrot.lane.b32.xlu0 %v2059_v23, %s2009_s21 }
  0x46   :  { %144 = vrot.lane.b32.xlu1 %v2047_v11, %s2010_s22 }
  0x47   :  { %142 = vrot.lane.b32.xlu0 %v2041_v7, %s2010_s22 }
  0x4a   :  { %148 = vrot.lane.b32.xlu1 %v2044_v10, %s2010_s22 }
  0x4b   :  { %146 = vrot.lane.b32.xlu0 %v2039_v3, %s2010_s22 }
  0x4e   :  { %152 = vrot.lane.b32.xlu1 %v2050_v16, %s2010_s22 }
  0x4f   :  { %150 = vrot.lane.b32.xlu0 %v2053_v17, %s2010_s22 }
  0x52   :  { %156 = vrot.lane.b32.xlu1 %v2056_v22, %s2010_s22 }
  0x53   :  { %154 = vrot.lane.b32.xlu0 %v2059_v23, %s2010_s22 }
  0x56   :  { %168 = vrot.lane.b32.xlu1 %v2047_v11, %s2011_s23 }
  0x57   :  { %166 = vrot.lane.b32.xlu0 %v2041_v7, %s2011_s23 }
  0x5a   :  { %172 = vrot.lane.b32.xlu1 %v2044_v10, %s2011_s23 }
  0x5b   :  { %170 = vrot.lane.b32.xlu0 %v2039_v3, %s2011_s23 }
  0x5e   :  { %176 = vrot.lane.b32.xlu1 %v2050_v16, %s2011_s23 }
  0x5f   :  { %174 = vrot.lane.b32.xlu0 %v2053_v17, %s2011_s23 }
  0x62   :  { %180 = vrot.lane.b32.xlu1 %v2056_v22, %s2011_s23 }
  0x63   :  { %178 = vrot.lane.b32.xlu0 %v2059_v23, %s2011_s23 }
  0x66   :  { %192 = vrot.lane.b32.xlu1 %v2047_v11, %s2012_s24 }
  0x67   :  { %190 = vrot.lane.b32.xlu0 %v2041_v7, %s2012_s24 }
  0x6a   :  { %196 = vrot.lane.b32.xlu1 %v2044_v10, %s2012_s24 }
  0x6b   :  { %194 = vrot.lane.b32.xlu0 %v2039_v3, %s2012_s24 }
  0x6e   :  { %200 = vrot.lane.b32.xlu1 %v2050_v16, %s2012_s24 }
  0x6f   :  { %198 = vrot.lane.b32.xlu0 %v2053_v17, %s2012_s24 }
  0x72   :  { %204 = vrot.lane.b32.xlu1 %v2056_v22, %s2012_s24 }
  0x73   :  { %202 = vrot.lane.b32.xlu0 %v2059_v23, %s2012_s24 }
  0x76   :  { %216 = vrot.lane.b32.xlu1 %v2047_v11, %s2013_s25 }
  0x77   :  { %214 = vrot.lane.b32.xlu0 %v2041_v7, %s2013_s25 }
  0x7a   :  { %220 = vrot.lane.b32.xlu1 %v2044_v10, %s2013_s25 }
  0x7b   :  { %218 = vrot.lane.b32.xlu0 %v2039_v3, %s2013_s25 }
  0x7e   :  { %224 = vrot.lane.b32.xlu1 %v2050_v16, %s2013_s25 }
  0x7f   :  { %222 = vrot.lane.b32.xlu0 %v2053_v17, %s2013_s25 }
  0x82   :  { %228 = vrot.lane.b32.xlu1 %v2056_v22, %s2013_s25 }
  0x83   :  { %226 = vrot.lane.b32.xlu0 %v2059_v23, %s2013_s25 }
  0x88   :  { %v2111_v24 = vpop.permute.xlu1 %74 }
  0x89   :  { %v2113_v25 = vpop.permute.xlu0 %70 }
  0x8c   :  { %v2115_v26 = vpop.permute.xlu1 %76 }
  0x8d   :  { %v2117_v27 = vpop.permute.xlu0 %72 }
  0x90   :  { %v2119_v28 = vpop.permute.xlu1 %80 }
  0x91   :  { %v2121_v29 = vpop.permute.xlu0 %78 }
  0x94   :  { %v2123_v30 = vpop.permute.xlu1 %84 }
  0x95   :  { %v2125_v31 = vpop.permute.xlu0 %82 }
  0x98   :  { %v97_v32 = vpop.permute.xlu1 %96 }
  0x99   :  { %v95_v33 = vpop.permute.xlu0 %94  ;;  %v374_v0 = vcombine.low %v2047_v11, %v97_v32  ;;  %v375_v1 = vcombine.high %v2047_v11, %v97_v32 }
  0x9a   :  { %v238_v4 = vcombine.low %v2041_v7, %v95_v33  ;;  %v239_v5 = vcombine.high %v2041_v7, %v95_v33 }
  0x9b   :  { %v2184_v13 = vrot.slane %v374_v0, %v2171_v2  ;;  %v2187_v11 = vrot.slane %v375_v1, %v2171_v2 }
  0x9c   :  { %v101_v34 = vpop.permute.xlu1 %100  ;;  %v2197_v21 = vrot.slane %v238_v4, %v2171_v2  ;;  %v2200_v32 = vrot.slane %v239_v5, %v2171_v2 }
  0x9d   :  { %v99_v35 = vpop.permute.xlu0 %98  ;;  %v646_v6 = vcombine.low %v2044_v10, %v101_v34  ;;  %v647_v14 = vcombine.high %v2044_v10, %v101_v34 }
  0x9e   :  { %v510_v15 = vcombine.low %v2039_v3, %v99_v35  ;;  %v511_v7 = vcombine.high %v2039_v3, %v99_v35 }
  0x9f   :  { %v2203_v33 = vrot.slane %v646_v6, %v2171_v2  ;;  %v2220_v53 = vrot.slane %v647_v14, %v2171_v2 }
  0xa0   :  { %v2127_v36 = vpop.permute.xlu1 %104 }
  0xa1   :  { %v2129_v37 = vpop.permute.xlu0 %102  ;;  %v918_v18 = vcombine.low %v2050_v16, %v2127_v36  ;;  %3288 = vst [vmem:[#allocation9_spill] sm:$0xff] %v2203_v33  ;;  %v919_v10 = vcombine.high %v2050_v16, %v2127_v36  ;;  %v2223_v16 = vrot.slane %v510_v15, %v2171_v2 }
  0xa2   :  { %v782_v34 = vcombine.low %v2053_v17, %v2129_v37 }
  0xa3   :  { %v2233_v57 = vrot.slane %v918_v18, %v2171_v2  ;;  %v2238_v63 = vrot.slane %v919_v10, %v2171_v2 }
  0xa4   :  { %v2131_v38 = vpop.permute.xlu1 %108  ;;  %v2249_v4 = vrot.slane %v782_v34, %v2171_v2 }
  0xa5   :  { %v2133_v39 = vpop.permute.xlu0 %106  ;;  %v1190_v35 = vcombine.low %v2056_v22, %v2131_v38  ;;  %v1191_v36 = vcombine.high %v2056_v22, %v2131_v38 }
  0xa6   :  { %v1055_v0 = vcombine.high %v2059_v23, %v2133_v39  ;;  %3289 = vst [vmem:[#allocation10_spill] sm:$0xff] %v2249_v4 }
  0xa7   :  { %v2255_v6 = vrot.slane %v1190_v35, %v2171_v2 }
  0xa8   :  { %v2135_v40 = vpop.permute.xlu1 %120  ;;  %v2277_v10 = vrot.slane %v1055_v0, %v2171_v2 }
  0xa9   :  { %v119_v41 = vpop.permute.xlu0 %118  ;;  %v391_v22 = vcombine.high %v2117_v27, %v2135_v40 }
  0xaa   :  { %v254_v19 = vcombine.low %v2113_v25, %v119_v41  ;;  %v255_v20 = vcombine.high %v2113_v25, %v119_v41  ;;  %v783_v25 = vcombine.high %v2053_v17, %v2129_v37  ;;  %v390_v41 = vcombine.low %v2117_v27, %v2135_v40 }
  0xab   :  { %v1054_v17 = vcombine.low %v2059_v23, %v2133_v39  ;;  %v2230_v37 = vrot.slane %v511_v7, %v2171_v2  ;;  %v2261_v27 = vrot.slane %v1191_v36, %v2171_v2  ;;  %v405_v34 = vrot.slane %v391_v22, %v2171_v2 }
  0xac   :  { %v2137_v42 = vpop.permute.xlu1 %124  ;;  %v262_v58 = vrot.slane %v254_v19, %v2171_v2  ;;  %v269_v59 = vrot.slane %v255_v20, %v2171_v2  ;;  %v2252_v5 = vrot.slane %v783_v25, %v2171_v2  ;;  %v398_v14 = vrot.slane %v390_v41, %v2171_v2 }
  0xad   :  { %v2139_v43 = vpop.permute.xlu0 %122  ;;  %v663_v38 = vcombine.high %v2115_v26, %v2137_v42  ;;  %3290 = vst [vmem:[#allocation11_spill] sm:$0xff] %v2261_v27  ;;  %v2264_v39 = vrot.slane %v1054_v17, %v2171_v2  ;;  %v662_v40 = vcombine.low %v2115_v26, %v2137_v42 }
  0xae   :  { %v526_v15 = vcombine.low %v2111_v24, %v2139_v43  ;;  %v527_v7 = vcombine.high %v2111_v24, %v2139_v43  ;;  %v302_v19 = vcombine.low %v2197_v21, %v262_v58  ;;  %v318_v20 = vcombine.low %v2200_v32, %v269_v59 }
  0xaf   :  { %v2281_v26 = vrot.slane %v663_v38, %v2171_v2  ;;  %v303_v35 = vcombine.high %v2197_v21, %v262_v58  ;;  %v319_v41 = vcombine.high %v2200_v32, %v269_v59  ;;  %v438_v36 = vcombine.low %v2184_v13, %v398_v14 }
  0xb0   :  { %v2141_v44 = vpop.permute.xlu1 %128  ;;  %v2295_v17 = vrot.slane %v662_v40, %v2171_v2  ;;  %v534_v0 = vrot.slane %v526_v15, %v2171_v2  ;;  %v2302_v22 = vrot.slane %v527_v7, %v2171_v2  ;;  %v2306_v21 = vrot.slane %v302_v19, %v2181_v12 }
  0xb1   :  { %v2143_v45 = vpop.permute.xlu0 %126  ;;  %v934_v18 = vcombine.low %v2119_v28, %v2141_v44  ;;  %v935_v42 = vcombine.high %v2119_v28, %v2141_v44  ;;  %v439_v44 = vcombine.high %v2184_v13, %v398_v14  ;;  %v2309_v32 = vrot.slane %v318_v20, %v2181_v12 }
  0xb2   :  { %v799_v24 = vcombine.high %v2121_v29, %v2143_v45  ;;  %3291 = vst [vmem:[#allocation12_spill] sm:$0xff] %v2295_v17  ;;  %v798_v28 = vcombine.low %v2121_v29, %v2143_v45  ;;  %v2330_v7 = vrot.slane %v303_v35, %v2181_v12  ;;  %v454_v20 = vcombine.low %v2187_v11, %v405_v34 }
  0xb3   :  { %v942_v38 = vrot.slane %v934_v18, %v2171_v2  ;;  %v2314_v59 = vrot.slane %v935_v42, %v2171_v2  ;;  %v2333_v18 = vrot.slane %v319_v41, %v2181_v12  ;;  %v455_v35 = vcombine.high %v2187_v11, %v405_v34 }
  0xb4   :  { %v2145_v46 = vpop.permute.xlu1 %132  ;;  %v2323_v14 = vrot.slane %v799_v24, %v2171_v2  ;;  %v2336_v19 = vrot.slane %v798_v28, %v2171_v2  ;;  %v574_v41 = vcombine.low %v2223_v16, %v534_v0 }
  0xb5   :  { %v2147_v47 = vpop.permute.xlu0 %130  ;;  %v1206_v29 = vcombine.low %v2123_v30, %v2145_v46  ;;  %v1207_v45 = vcombine.high %v2123_v30, %v2145_v46  ;;  %v2339_v30 = vrot.slane %v438_v36, %v2181_v12  ;;  %v2342_v46 = vrot.slane %v439_v44, %v2181_v12 }
  0xb6   :  { %v1071_v40 = vcombine.high %v2125_v31, %v2147_v47  ;;  %3292 = vst [vmem:[#allocation13_spill] sm:$0xff] %v2336_v19  ;;  %v982_v42 = vcombine.low %v2233_v57, %v942_v38  ;;  %v1070_v24 = vcombine.low %v2125_v31, %v2147_v47  ;;  %v983_v28 = vcombine.high %v2233_v57, %v942_v38 }
  0xb7   :  { %3293 = vst [vmem:[#allocation14_spill] sm:$0xff] %v2342_v46  ;;  %v2354_v54 = vrot.slane %v1206_v29, %v2171_v2  ;;  %v2357_v44 = vrot.slane %v1207_v45, %v2171_v2  ;;  %v2373_v38 = vrot.slane %v454_v20, %v2181_v12  ;;  %v575_v29 = vcombine.high %v2223_v16, %v534_v0 }
  0xb8   :  { %v2149_v48 = vpop.permute.xlu1 %144  ;;  %v2366_v11 = vrot.slane %v1071_v40, %v2171_v2  ;;  %v590_v45 = vcombine.low %v2230_v37, %v2302_v22  ;;  %v710_v31 = vcombine.low %v2203_v33, %v2295_v17  ;;  %v2381_v47 = vrot.slane %v1070_v24, %v2171_v2 }
  0xb9   :  { %v2151_v49 = vpop.permute.xlu0 %142  ;;  %3294 = vst [vmem:[#allocation15_spill] sm:$0xff] %v2357_v44  ;;  %3295 = vst [vmem:[#allocation16_spill] sm:$0xff] %v2373_v38  ;;  %v2384_v40 = vrot.slane %v455_v35, %v2181_v12  ;;  %v2387_v36 = vrot.slane %v574_v41, %v2181_v12  ;;  %v846_v20 = vcombine.low %v2249_v4, %v2336_v19 }
  0xba   :  { %v1254_v16 = vcombine.low %v2255_v6, %v2354_v54  ;;  %v2408_v60 = vrot.slane %v575_v29, %v2181_v12  ;;  %v2411_v24 = vrot.slane %v590_v45, %v2181_v12  ;;  %v2414_v38 = vrot.slane %v710_v31, %v2181_v12 }
  0xbb   :  { %3296 = vst [vmem:[#allocation17_spill] sm:$0xff] %v2384_v40  ;;  %3297 = vst [vmem:[#allocation18_spill] sm:$0xff] %v2387_v36  ;;  %v726_v40 = vcombine.low %v2220_v53, %v2281_v26  ;;  %v2417_v41 = vrot.slane %v846_v20, %v2181_v12  ;;  %v2422_v46 = vrot.slane %v982_v42, %v2181_v12 }
  0xbc   :  { %v2153_v50 = vpop.permute.xlu1 %148  ;;  %3298 = vst [vmem:[#allocation19_spill] sm:$0xff] %v2408_v60  ;;  %3299 = vst [vmem:[#allocation20_spill] sm:$0xff] %v2411_v24  ;;  %v1118_v44 = vcombine.low %v2264_v39, %v2381_v47  ;;  %v2427_v60 = vrot.slane %v983_v28, %v2181_v12  ;;  %v591_v31 = vcombine.high %v2230_v37, %v2302_v22 }
  0xbd   :  { %v2155_v51 = vpop.permute.xlu0 %146  ;;  %3300 = vst [vmem:[#allocation21_spill] sm:$0xff] %v2414_v38  ;;  %3301 = vst [vmem:[#allocation22_spill] sm:$0xff] %v2417_v41  ;;  %v862_v45 = vcombine.low %v2252_v5, %v2323_v14  ;;  %v2440_v28 = vrot.slane %v726_v40, %v2181_v12 }
  0xbe   :  { %3302 = vst [vmem:[#allocation23_spill] sm:$0xff] %v2422_v46  ;;  %3303 = vst [vmem:[#allocation24_spill] sm:$0xff] %v2427_v60  ;;  %v2459_v38 = vrot.slane %v591_v31, %v2181_v12 }
  0xbf   :  { %3304 = vst [vmem:[#allocation25_spill] sm:$0xff] %v2440_v28 }
  0xc0   :  { %v2157_v55 = vpop.permute.xlu1 %152  ;;  %3306 = vst [vmem:[#allocation27_spill] sm:$0xff] %v2459_v38 }
  0xc1   :  { %v2159_v56 = vpop.permute.xlu0 %150 }
  0xc4   :  { %v2164_v61 = vpop.permute.xlu1 %156 }
  0xc5   :  { %v2166_v62 = vpop.permute.xlu0 %154 }
  0xc8   :  { %v2176_v8 = vpop.permute.xlu1 %168 }
  0xc9   :  { %v2178_v9 = vpop.permute.xlu0 %166 }
  0xcc   :  { %v2207_v3 = vpop.permute.xlu1 %172 }
  0xcd   :  { %v2217_v52 = vpop.permute.xlu0 %170 }
  0xd0   :  { %v2246_v1 = vpop.permute.xlu1 %176 }
  0xd1   :  { %v2258_v23 = vpop.permute.xlu0 %174 }
  0xd4   :  { %v2285_v25 = vpop.permute.xlu1 %180 }
  0xd5   :  { %v2289_v43 = vpop.permute.xlu0 %178 }
  0xd8   :  { %v2320_v13 = vpop.permute.xlu1 %192 }
  0xd9   :  { %v2327_v15 = vpop.permute.xlu0 %190  ;;  %v406_v42 = vcombine.low %v2149_v48, %v2320_v13  ;;  %v407_v37 = vcombine.high %v2149_v48, %v2320_v13 }
  0xda   :  { %v270_v22 = vcombine.low %v2151_v49, %v2327_v15  ;;  %v271_v41 = vcombine.high %v2151_v49, %v2327_v15  ;;  %v2465_v49 = vrot.slane %v1254_v16, %v2181_v12 }
  0xdc   :  { %v2359_v58 = vpop.permute.xlu1 %196  ;;  %3308 = vst [vmem:[#allocation29_spill] sm:$0xff] %v2465_v49 }
  0xdd   :  { %v679_v57 = vcombine.high %v2153_v50, %v2359_v58  ;;  %v2370_v34 = vpop.permute.xlu0 %194 }
  0xde   :  { %v543_v40 = vcombine.high %v2155_v51, %v2370_v34 }
  0xe0   :  { %v201_v35 = vpop.permute.xlu1 %200 }
  0xe1   :  { %v951_v4 = vcombine.high %v2157_v55, %v201_v35  ;;  %v199_v19 = vpop.permute.xlu0 %198  ;;  %v950_v48 = vcombine.low %v2157_v55, %v201_v35  ;;  %v278_v35 = vrot.slane %v270_v22, %v2171_v2 }
  0xe2   :  { %v815_v0 = vcombine.high %v2159_v56, %v199_v19 }
  0xe4   :  { %v205_v29 = vpop.permute.xlu1 %204 }
  0xe5   :  { %v1222_v36 = vcombine.low %v2164_v61, %v205_v29  ;;  %v1223_v17 = vcombine.high %v2164_v61, %v205_v29  ;;  %v203_v33 = vpop.permute.xlu0 %202  ;;  %v542_v61 = vcombine.low %v2155_v51, %v2370_v34  ;;  %v2455_v29 = vrot.slane %v1118_v44, %v2181_v12 }
  0xe6   :  { %v1086_v60 = vcombine.low %v2166_v62, %v203_v33  ;;  %v1087_v20 = vcombine.high %v2166_v62, %v203_v33  ;;  %v2462_v62 = vrot.slane %v862_v45, %v2181_v12  ;;  %v2468_v33 = vrot.slane %v406_v42, %v2171_v2 }
  0xe7   :  { %3305 = vst [vmem:[#allocation26_spill] sm:$0xff] %v2455_v29  ;;  %v814_v51 = vcombine.low %v2159_v56, %v199_v19  ;;  %v2474_v34 = vrot.slane %v407_v37, %v2171_v2  ;;  %v285_v45 = vrot.slane %v271_v41, %v2171_v2  ;;  %v2481_v42 = vrot.slane %v679_v57, %v2171_v2 }
  0xe8   :  { %v217_v13 = vpop.permute.xlu1 %216  ;;  %3307 = vst [vmem:[#allocation28_spill] sm:$0xff] %v2462_v62  ;;  %v2484_v56 = vrot.slane %v542_v61, %v2171_v2  ;;  %v2490_v19 = vrot.slane %v950_v48, %v2171_v2  ;;  %v2500_v57 = vrot.slane %v951_v4, %v2171_v2  ;;  %v2520_v4 = vrot.slane %v1086_v60, %v2171_v2 }
  0xe9   :  { %v422_v15 = vcombine.low %v2176_v8, %v217_v13  ;;  %v423_v44 = vcombine.high %v2176_v8, %v217_v13  ;;  %v215_v55 = vpop.permute.xlu0 %214  ;;  %v2487_v8 = vrot.slane %v543_v40, %v2171_v2  ;;  %v2503_v61 = vrot.slane %v814_v51, %v2171_v2 }
  0xea   :  { %v286_v31 = vcombine.low %v2178_v9, %v215_v55  ;;  %v287_v16 = vcombine.high %v2178_v9, %v215_v55  ;;  %v2506_v40 = vrot.slane %v815_v0, %v2171_v2  ;;  %v2517_v55 = vrot.slane %v1223_v17, %v2171_v2 }
  0xeb   :  { %v2493_v37 = vrot.slane %v422_v15, %v2171_v2  ;;  %v2509_v48 = vrot.slane %v423_v44, %v2171_v2  ;;  %v2514_v15 = vrot.slane %v1222_v36, %v2171_v2  ;;  %v2523_v51 = vrot.slane %v1087_v20, %v2171_v2 }
  0xec   :  { %v294_v22 = vrot.slane %v286_v31, %v2171_v2  ;;  %v301_v9 = vrot.slane %v287_v16, %v2171_v2  ;;  %v2497_v41 = vpop.permute.xlu1 %220 }
  0xed   :  { %v2511_v13 = vpop.permute.xlu0 %218  ;;  %v695_v44 = vcombine.high %v2207_v3, %v2497_v41  ;;  %v470_v36 = vcombine.low %v2468_v33, %v2493_v37  ;;  %v471_v17 = vcombine.high %v2468_v33, %v2493_v37 }
  0xee   :  { %v334_v31 = vcombine.low %v278_v35, %v294_v22  ;;  %v350_v0 = vcombine.low %v285_v45, %v301_v9  ;;  %v559_v16 = vcombine.high %v2217_v52, %v2511_v13  ;;  %v335_v60 = vcombine.high %v278_v35, %v294_v22 }
  0xef   :  { %v351_v49 = vcombine.high %v285_v45, %v301_v9  ;;  %v2536_v38 = vrot.slane %v695_v44, %v2171_v2  ;;  %v558_v44 = vcombine.low %v2217_v52, %v2511_v13 }
  0xf0   :  { %v225_v62 = vpop.permute.xlu1 %224  ;;  %v2539_v29 = vrot.slane %v559_v16, %v2171_v2  ;;  %v342_v46 = vrot.slane %v334_v31, %v2181_v12  ;;  %v2553_v16 = vrot.slane %v350_v0, %v2181_v12 }
  0xf1   :  { %v223_v28 = vpop.permute.xlu0 %222  ;;  %v966_v24 = vcombine.low %v2246_v1, %v225_v62  ;;  %v967_v27 = vcombine.high %v2246_v1, %v225_v62 }
  0xf2   :  { %v830_v35 = vcombine.low %v2258_v23, %v223_v28  ;;  %v831_v45 = vcombine.high %v2258_v23, %v223_v28  ;;  %v2560_v23 = vrot.slane %v335_v60, %v2181_v12  ;;  %v2563_v28 = vrot.slane %v351_v49, %v2181_v12 }
  0xf3   :  { %v2566_v9 = vrot.slane %v966_v24, %v2171_v2  ;;  %v2569_v52 = vrot.slane %v967_v27, %v2171_v2  ;;  %v367_v22 = vcombine.high %v2306_v21, %v342_v46  ;;  %v366_v49 = vcombine.low %v2306_v21, %v342_v46 }
  0xf4   :  { %v229_v62 = vpop.permute.xlu1 %228  ;;  %v2572_v13 = vrot.slane %v830_v35, %v2171_v2  ;;  %v2575_v0 = vrot.slane %v831_v45, %v2171_v2  ;;  %v370_v21 = vcombine.low %v2309_v32, %v2553_v16  ;;  %v487_v46 = vcombine.high %v2474_v34, %v2509_v48 }
  0xf5   :  { %v1238_v1 = vcombine.low %v2285_v25, %v229_v62  ;;  %v1239_v60 = vcombine.high %v2285_v25, %v229_v62  ;;  %v227_v31 = vpop.permute.xlu0 %226  ;;  %v1330_v45 = vsel %vm1326_vm0, %v367_v22, -inf  ;;  %v1327_v24 = vsel %vm1326_vm0, %v366_v49, -inf }
  0xf6   :  { %1331 = vmax.xlane.f32.xlu1 %v1330_v45  ;;  %1328 = vmax.xlane.f32.xlu0 %v1327_v24  ;;  %v1102_v62 = vcombine.low %v2289_v43, %v227_v31  ;;  %v1103_v25 = vcombine.high %v2289_v43, %v227_v31  ;;  %v566_v24 = vrot.slane %v558_v44, %v2171_v2 }
  0xf7   :  { %v2598_v27 = vrot.slane %v1238_v1, %v2171_v2  ;;  %v2601_v35 = vrot.slane %v1239_v60, %v2171_v2  ;;  %v368_v31 = vcombine.low %v2330_v7, %v2560_v23  ;;  %v1339_v60 = vsel %vm1326_vm0, %v370_v21, -inf }
  0xf8   :  { %v2619_v45 = vrot.slane %v1102_v62, %v2171_v2  ;;  %v2622_v43 = vrot.slane %v1103_v25, %v2171_v2  ;;  %v372_v22 = vcombine.low %v2333_v18, %v2563_v28  ;;  %v478_v49 = vrot.slane %v470_v36, %v2181_v12 }
  0xf9   :  { %v694_v21 = vcombine.low %v2207_v3, %v2497_v41  ;;  %v1333_v20 = vsel %vm1326_vm0, %v368_v31, -inf  ;;  %v369_v36 = vcombine.high %v2330_v7, %v2560_v23  ;;  %v3309_v44 = vcombine.high %v2264_v39, %v2381_v47 }
  0xfa   :  { %1340 = vmax.xlane.f32.xlu1 %v1339_v60  ;;  %v678_v62 = vcombine.low %v2153_v50, %v2359_v58  ;;  %v606_v1 = vcombine.low %v2484_v56, %v566_v24  ;;  %1334 = vmax.xlane.f32.xlu0 %v1333_v20  ;;  %v3310_v3 = vcombine.high %v2220_v53, %v2281_v26  ;;  %v1345_v39 = vsel %vm1326_vm0, %v372_v22, -inf }
  0xfb   :  { %v2649_v25 = vrot.slane %v3309_v44, %v2181_v12  ;;  %v3311_v7 = vcombine.low %v2238_v63, %v2314_v59  ;;  %v502_v47 = vcombine.low %v2339_v30, %v478_v49  ;;  %v485_v50 = vrot.slane %v471_v17, %v2181_v12  ;;  %v3317_v44 = vld [vmem:[#allocation11_spill] sm:$0xff] }
  0xfc   :  { %v2658_v41 = vrot.slane %v3310_v3, %v2181_v12  ;;  %v3312_v53 = vcombine.high %v2255_v6, %v2354_v54  ;;  %v3313_v58 = vcombine.low %v2474_v34, %v2509_v48  ;;  %v501_v60 = vrot.slane %v487_v46, %v2181_v12 }
  0xfd   :  { %v2664_v23 = vrot.slane %v3311_v7, %v2181_v12  ;;  %v3314_v22 = vcombine.high %v2252_v5, %v2323_v14  ;;  %v3315_v54 = vcombine.low %v2277_v10, %v2366_v11  ;;  %v702_v37 = vrot.slane %v694_v21, %v2171_v2  ;;  %v3318_v21 = vld [vmem:[#allocation15_spill] sm:$0xff] }
  0xfe   :  { %v2676_v26 = vrot.slane %v3312_v53, %v2181_v12  ;;  %1346 = vmax.xlane.f32.xlu1 %v1345_v39  ;;  %v494_v20 = vrot.slane %v3313_v58, %v2181_v12  ;;  %v607_v17 = vcombine.high %v2484_v56, %v566_v24  ;;  %v1336_v34 = vsel %vm1326_vm0, %v369_v36, -inf }
  0xff   :  { %v2687_v33 = vrot.slane %v3314_v22, %v2181_v12  ;;  %v2693_v6 = vrot.slane %v3315_v54, %v2181_v12  ;;  %v371_v48 = vcombine.high %v2309_v32, %v2553_v16  ;;  %v686_v46 = vrot.slane %v678_v62, %v2171_v2  ;;  %1337 = vmax.xlane.f32.xlu0 %v1336_v34  ;;  %v3320_v32 = vld [vmem:[#allocation14_spill] sm:$0xff]  ;;  %v3321_v62 = vld [vmem:[#allocation16_spill] sm:$0xff] }
 0x100   :  { %v614_v5 = vrot.slane %v606_v1, %v2181_v12  ;;  %v3316_v14 = vcombine.high %v2238_v63, %v2314_v59  ;;  %v3319_v56 = vcombine.low %v3317_v44, %v3318_v21  ;;  %v1351_v36 = vsel %vm1326_vm0, %v502_v47, -inf  ;;  %v3322_v59 = vld [vmem:[#allocation17_spill] sm:$0xff] }
 0x101   :  { %v504_v16 = vcombine.low %v3320_v32, %v485_v50  ;;  %v373_v2 = vcombine.high %v2333_v18, %v2563_v28  ;;  %v503_v1 = vcombine.high %v2339_v30, %v478_v49  ;;  %v506_v63 = vcombine.low %v3321_v62, %v494_v20  ;;  %v3324_v49 = vld [vmem:[#allocation18_spill] sm:$0xff] }
 0x102   :  { %v2706_v31 = vrot.slane %v3316_v14, %v2181_v12  ;;  %v2712_v24 = vrot.slane %v3319_v56, %v2181_v12  ;;  %1352 = vmax.xlane.f32.xlu1 %v1351_v36  ;;  %v508_v3 = vcombine.low %v3322_v59, %v501_v60  ;;  %v505_v7 = vcombine.high %v3320_v32, %v485_v50 }
 0x103   :  { %v3323_v39 = vcombine.high %v2277_v10, %v2366_v11  ;;  %v742_v47 = vcombine.low %v686_v46, %v702_v37  ;;  %v1342_v58 = vsel %vm1326_vm0, %v371_v48, -inf  ;;  %v507_v18 = vcombine.high %v3321_v62, %v494_v20 }
 0x104   :  { %v2731_v30 = vrot.slane %v607_v17, %v2181_v12  ;;  %v743_v28 = vcombine.high %v686_v46, %v702_v37  ;;  %1343 = vmax.xlane.f32.xlu0 %v1342_v58  ;;  %v638_v22 = vcombine.low %v3324_v49, %v614_v5  ;;  %v3325_v50 = vcombine.low %v2487_v8, %v2539_v29 }
 0x105   :  { %v2726_v53 = vrot.slane %v3323_v39, %v2181_v12  ;;  %v3327_v10 = vcombine.high %v3317_v44, %v3318_v21  ;;  %v1357_v20 = vsel %vm1326_vm0, %v504_v16, -inf  ;;  %v1348_v17 = vsel %vm1326_vm0, %v373_v2, -inf  ;;  %v3328_v21 = vld [vmem:[#allocation19_spill] sm:$0xff] }
 0x106   :  { %v2738_v54 = vrot.slane %v3325_v50, %v2181_v12  ;;  %v1354_v37 = vsel %vm1326_vm0, %v503_v1, -inf  ;;  %v509_v34 = vcombine.high %v3322_v59, %v501_v60  ;;  %1358 = vmax.xlane.f32.xlu1 %v1357_v20  ;;  %v1363_v48 = vsel %vm1326_vm0, %v506_v63, -inf  ;;  %v3330_v1 = vld [vmem:[#allocation20_spill] sm:$0xff]  ;;  %v3333_v39 = vld [vmem:[#allocation23_spill] sm:$0xff]  ;;  %v3335_v20 = vld [vmem:[#allocation25_spill] sm:$0xff] }
 0x107   :  { %v2744_v11 = vrot.slane %v3327_v10, %v2181_v12  ;;  %v1369_v46 = vsel %vm1326_vm0, %v508_v3, -inf  ;;  %v1360_v14 = vsel %vm1326_vm0, %v505_v7, -inf  ;;  %v639_v56 = vcombine.high %v3324_v49, %v614_v5 }
 0x108   :  { %3326 = vst [vmem:[#allocation11_spill] sm:$0xff] %v2738_v54  ;;  %v1366_v44 = vsel %vm1326_vm0, %v507_v18, -inf  ;;  %v640_v36 = vcombine.low %v3328_v21, %v2731_v30  ;;  %v2758_v32 = vrot.slane %v742_v47, %v2181_v12  ;;  %v3329_v60 = vcombine.low %v2490_v19, %v2566_v9  ;;  %1349 = vmax.xlane.f32.xlu0 %v1348_v17 }
 0x109   :  { %v1375_v2 = vsel %vm1326_vm0, %v638_v22, -inf  ;;  %v642_v5 = vcombine.low %v3330_v1, %v2738_v54  ;;  %v3331_v62 = vcombine.low %v2503_v61, %v2572_v13  ;;  %v3332_v59 = vcombine.low %v2481_v42, %v2536_v38  ;;  %v3341_v54 = vld [vmem:[#allocation24_spill] sm:$0xff] }
 0x10a   :  { %v2764_v16 = vrot.slane %v3329_v60, %v2181_v12  ;;  %v2780_v7 = vsel %vm1326_vm0, %v509_v34, -inf  ;;  %v3334_v18 = vcombine.low %v2520_v4, %v2619_v45  ;;  %1364 = vmax.xlane.f32.xlu1 %v1363_v48  ;;  %v2791_v22 = vsel %vm1326_vm0, %v639_v56, -inf  ;;  %v3336_v60 = vld [vmem:[#allocation21_spill] sm:$0xff] }
 0x10b   :  { %v2773_v63 = vrot.slane %v3331_v62, %v2181_v12  ;;  %v766_v3 = vrot.slane %v3332_v59, %v2181_v12  ;;  %v2796_v10 = vrot.slane %v743_v28, %v2181_v12  ;;  %v1381_v34 = vsel %vm1326_vm0, %v640_v36, -inf  ;;  %v3337_v59 = vld [vmem:[#allocation26_spill] sm:$0xff] }
 0x10c   :  { %v1158_v49 = vrot.slane %v3334_v18, %v2181_v12  ;;  %v3338_v48 = vcombine.high %v2490_v19, %v2566_v9  ;;  %1355 = vmax.xlane.f32.xlu0 %v1354_v37  ;;  %v1387_v18 = vsel %vm1326_vm0, %v642_v5, -inf  ;;  %v3339_v28 = vld [vmem:[#allocation22_spill] sm:$0xff]  ;;  %v3340_v36 = vcombine.high %v2487_v8, %v2539_v29 }
 0x10d   :  { %v778_v17 = vcombine.low %v3335_v20, %v766_v3  ;;  %v3342_v37 = vcombine.low %v2506_v40, %v2575_v0  ;;  %v779_v47 = vcombine.high %v3335_v20, %v766_v3  ;;  %v3344_v29 = vcombine.high %v2520_v4, %v2619_v45 }
 0x10e   :  { %v1182_v58 = vcombine.low %v3337_v59, %v1158_v49  ;;  %v1029_v56 = vrot.slane %v3338_v48, %v2181_v12  ;;  %v637_v62 = vrot.slane %v3340_v36, %v2181_v12  ;;  %v1183_v9 = vcombine.high %v3337_v59, %v1158_v49  ;;  %1370 = vmax.xlane.f32.xlu1 %v1369_v46  ;;  %v3345_v59 = vld [vmem:[#allocation28_spill] sm:$0xff] }
 0x10f   :  { %v2811_v50 = vsel %vm1326_vm0, %v778_v17, -inf  ;;  %v902_v5 = vrot.slane %v3342_v37, %v2181_v12  ;;  %v3343_v17 = vld [vmem:[#allocation27_spill] sm:$0xff]  ;;  %v1165_v8 = vrot.slane %v3344_v29, %v2181_v12  ;;  %v3346_v46 = vcombine.low %v2514_v15, %v2598_v27 }
 0x110   :  { %v2818_v1 = vsel %vm1326_vm0, %v1182_v58, -inf  ;;  %v1048_v19 = vcombine.low %v3341_v54, %v1029_v56  ;;  %v644_v48 = vcombine.low %v3343_v17, %v637_v62  ;;  %v1049_v58 = vcombine.high %v3341_v54, %v1029_v56  ;;  %1361 = vmax.xlane.f32.xlu0 %v1360_v14 }
 0x111   :  { %v2837_v49 = vsel %vm1326_vm0, %v1183_v9, -inf  ;;  %v914_v37 = vcombine.low %v3345_v59, %v902_v5  ;;  %v1294_v3 = vrot.slane %v3346_v46, %v2181_v12  ;;  %v2848_v4 = vsel %vm1326_vm0, %v779_v47, -inf }
 0x112   :  { %v2834_v36 = vsel %vm1326_vm0, %v1048_v19, -inf  ;;  %v2845_v20 = vsel %vm1326_vm0, %v644_v48, -inf  ;;  %v1184_v45 = vcombine.low %v2649_v25, %v1165_v8  ;;  %v2852_v54 = vsel %vm1326_vm0, %v1049_v58, -inf  ;;  %v3348_v19 = vld [vmem:[#allocation29_spill] sm:$0xff]  ;;  %1376 = vmax.xlane.f32.xlu1 %v1375_v2 }
 0x113   :  { %3347 = vst [vmem:[#allocation15_spill] sm:$0xff] %v2852_v54  ;;  %v2855_v56 = vsel %vm1326_vm0, %v914_v37, -inf  ;;  %v1319_v9 = vcombine.high %v3348_v19, %v1294_v3  ;;  %v1318_v29 = vcombine.low %v3348_v19, %v1294_v3  ;;  %v3349_v14 = vcombine.high %v2481_v42, %v2536_v38 }
 0x114   :  { %v2864_v47 = vsel %vm1326_vm0, %v1184_v45, -inf  ;;  %v645_v46 = vcombine.high %v3343_v17, %v637_v62  ;;  %v3350_v58 = vcombine.low %v2500_v57, %v2569_v52  ;;  %v915_v54 = vcombine.high %v3345_v59, %v902_v5  ;;  %1367 = vmax.xlane.f32.xlu0 %v1366_v44 }
 0x115   :  { %v773_v48 = vrot.slane %v3349_v14, %v2181_v12  ;;  %v2873_v3 = vsel %vm1326_vm0, %v1319_v9, -inf  ;;  %v2876_v19 = vsel %vm1326_vm0, %v1318_v29, -inf  ;;  %v3351_v42 = vcombine.high %v2514_v15, %v2598_v27 }
 0x116   :  { %v1038_v37 = vrot.slane %v3350_v58, %v2181_v12  ;;  %v2884_v62 = vsel %vm1326_vm0, %v645_v46, -inf  ;;  %v2888_v5 = vsel %vm1326_vm0, %v915_v54, -inf  ;;  %v1185_v59 = vcombine.high %v2649_v25, %v1165_v8  ;;  %1382 = vmax.xlane.f32.xlu1 %v1381_v34 }
 0x117   :  { %v780_v38 = vcombine.low %v2658_v41, %v773_v48  ;;  %v1301_v2 = vrot.slane %v3351_v42, %v2181_v12  ;;  %v3352_v15 = vcombine.high %v2506_v40, %v2575_v0  ;;  %v781_v44 = vcombine.high %v2658_v41, %v773_v48 }
 0x118   :  { %v1050_v17 = vcombine.low %v2664_v23, %v1038_v37  ;;  %v2904_v54 = vsel %vm1326_vm0, %v1185_v59, -inf  ;;  %v3353_v25 = vcombine.low %v2523_v51, %v2622_v43  ;;  %v1051_v14 = vcombine.high %v2664_v23, %v1038_v37  ;;  %1373 = vmax.xlane.f32.xlu0 %v2780_v7 }
 0x119   :  { %v2892_v45 = vsel %vm1326_vm0, %v780_v38, -inf  ;;  %v1320_v9 = vcombine.low %v2676_v26, %v1301_v2  ;;  %v909_v27 = vrot.slane %v3352_v15, %v2181_v12  ;;  %v2916_v0 = vsel %vm1326_vm0, %v781_v44, -inf }
 0x11a   :  { %v2901_v29 = vsel %vm1326_vm0, %v1050_v17, -inf  ;;  %v1174_v8 = vrot.slane %v3353_v25, %v2181_v12  ;;  %v2922_v48 = vsel %vm1326_vm0, %v1051_v14, -inf  ;;  %v1321_v58 = vcombine.high %v2676_v26, %v1301_v2  ;;  %1388 = vmax.xlane.f32.xlu1 %v1387_v18 }
 0x11b   :  { %v2912_v46 = vsel %vm1326_vm0, %v1320_v9, -inf  ;;  %v916_v40 = vcombine.low %v2687_v33, %v909_v27  ;;  %v917_v41 = vcombine.high %v2687_v33, %v909_v27  ;;  %v3354_v33 = vcombine.high %v2500_v57, %v2569_v52 }
 0x11c   :  { %v1186_v34 = vcombine.low %v2693_v6, %v1174_v8  ;;  %v1187_v23 = vcombine.high %v2693_v6, %v1174_v8  ;;  %v3355_v42 = vcombine.low %v2517_v55, %v2601_v35  ;;  %v2944_v6 = vsel %vm1326_vm0, %v1321_v58, -inf  ;;  %1379 = vmax.xlane.f32.xlu0 %v2791_v22 }
 0x11d   :  { %v2927_v37 = vsel %vm1326_vm0, %v916_v40, -inf  ;;  %v2930_v38 = vsel %vm1326_vm0, %v917_v41, -inf  ;;  %v1045_v7 = vrot.slane %v3354_v33, %v2181_v12  ;;  %v3356_v57 = vcombine.high %v2523_v51, %v2622_v43  ;;  %v3361_v33 = vld [vmem:[#allocation12_spill] sm:$0xff] }
 0x11e   :  { %v1310_v17 = vrot.slane %v3355_v42, %v2181_v12  ;;  %v2941_v26 = vsel %vm1326_vm0, %v1186_v34, -inf  ;;  %v2947_v2 = vsel %vm1326_vm0, %v1187_v23, -inf  ;;  %v3357_v27 = vcombine.high %v3336_v60, %v2758_v32  ;;  %v3360_v23 = vld [vmem:[#allocation9_spill] sm:$0xff] }
 0x11f   :  { %v1181_v52 = vrot.slane %v3356_v57, %v2181_v12  ;;  %v1052_v59 = vcombine.low %v2706_v31, %v1045_v7  ;;  %v1053_v9 = vcombine.high %v2706_v31, %v1045_v7  ;;  %v3358_v51 = vcombine.high %v2517_v55, %v2601_v35 }
 0x120   :  { %v1322_v18 = vcombine.low %v2712_v24, %v1310_v17  ;;  %v1323_v15 = vcombine.high %v2712_v24, %v1310_v17  ;;  %v1402_v44 = vsel %vm1326_vm0, %v3357_v27, -inf  ;;  %v3359_v41 = vcombine.high %v3328_v21, %v2731_v30 }
 0x121   :  { %v1188_v25 = vcombine.low %v2726_v53, %v1181_v52  ;;  %v1317_v43 = vrot.slane %v3358_v51, %v2181_v12  ;;  %v1189_v31 = vcombine.high %v2726_v53, %v1181_v52  ;;  %v2969_v8 = vsel %vm1326_vm0, %v1052_v59, -inf  ;;  %1403 = vmax.xlane.f32.xlu1 %v1402_v44  ;;  %v3364_v59 = vld [vmem:[#allocation13_spill] sm:$0xff] }
 0x122   :  { %v2972_v24 = vsel %vm1326_vm0, %v1053_v9, -inf  ;;  %v2975_v22 = vsel %vm1326_vm0, %v1322_v18, -inf  ;;  %v2978_v14 = vsel %vm1326_vm0, %v1323_v15, -inf  ;;  %v1384_v34 = vsel %vm1326_vm0, %v3359_v41, -inf  ;;  %v3365_v9 = vld [vmem:[#allocation10_spill] sm:$0xff] }
 0x123   :  { %v2981_v40 = vsel %vm1326_vm0, %v1188_v25, -inf  ;;  %v1324_v55 = vcombine.low %v2744_v11, %v1317_v43  ;;  %v2985_v35 = vsel %vm1326_vm0, %v1189_v31, -inf  ;;  %v1325_v53 = vcombine.high %v2744_v11, %v1317_v43  ;;  %1385 = vmax.xlane.f32.xlu0 %v1384_v34  ;;  %v3368_v31 = vld [vmem:[#allocation11_spill] sm:$0xff] }
 0x124   :  { %v774_v58 = vcombine.low %v3336_v60, %v2758_v32  ;;  %v3362_v7 = vcombine.high %v3360_v23, %v3361_v33  ;;  %v3363_v11 = vcombine.low %v3339_v28, %v2773_v63  ;;  %v847_v18 = vcombine.high %v3365_v9, %v3364_v59 }
 0x125   :  { %v1513_v17 = vsel %vm1326_vm0, %v1324_v55, -inf  ;;  %v1516_v57 = vsel %vm1326_vm0, %v1325_v53, -inf  ;;  %v911_v27 = vcombine.high %v3339_v28, %v2773_v63  ;;  %v3366_v44 = vcombine.high %v2503_v61, %v2572_v13  ;;  %v3369_v55 = vld [vmem:[#allocation20_spill] sm:$0xff] }
 0x126   :  { %v725_v42 = vrot.slane %v3362_v7, %v2181_v12  ;;  %v1423_v30 = vsel %vm1326_vm0, %v3363_v11, -inf  ;;  %v1399_v32 = vsel %vm1326_vm0, %v774_v58, -inf  ;;  %v861_v43 = vrot.slane %v847_v18, %v2181_v12 }
 0x127   :  { %1424 = vmax.xlane.f32.xlu1 %v1423_v30  ;;  %1400 = vmax.xlane.f32.xlu0 %v1399_v32  ;;  %v893_v25 = vrot.slane %v3366_v44, %v2181_v12  ;;  %v643_v53 = vcombine.high %v3369_v55, %v3368_v31  ;;  %v1426_v41 = vsel %vm1326_vm0, %v911_v27, -inf  ;;  %v3370_v12 = vcombine.high %v3333_v39, %v2764_v16 }
 0x128   :  { %v777_v21 = vcombine.high %v725_v42, %v2796_v10  ;;  %v776_v60 = vcombine.low %v725_v42, %v2796_v10  ;;  %v3367_v10 = vcombine.low %v3333_v39, %v2764_v16  ;;  %v3371_v16 = vld [vmem:[#allocation15_spill] sm:$0xff] }
 0x129   :  { %v912_v63 = vcombine.low %v861_v43, %v893_v25  ;;  %v1390_v28 = vsel %vm1326_vm0, %v643_v53, -inf  ;;  %v913_v61 = vcombine.high %v861_v43, %v893_v25  ;;  %v1450_v58 = vsel %vm1326_vm0, %v3370_v12, -inf }
 0x12a   :  { %v1408_v52 = vsel %vm1326_vm0, %v777_v21, -inf  ;;  %v1405_v15 = vsel %vm1326_vm0, %v776_v60, -inf  ;;  %v1447_v51 = vsel %vm1326_vm0, %v3367_v10, -inf }
 0x12b   :  { %1409 = vmax.xlane.f32.xlu1 %v1408_v52  ;;  %1406 = vmax.xlane.f32.xlu0 %v1405_v15  ;;  %v1429_v13 = vsel %vm1326_vm0, %v912_v63, -inf  ;;  %v1432_v34 = vsel %vm1326_vm0, %v913_v61, -inf }
 0x12f   :  { %1448 = vmax.xlane.f32.xlu1 %v1447_v51  ;;  %1427 = vmax.xlane.f32.xlu0 %v1426_v41 }
 0x133   :  { %1391 = vmax.xlane.f32.xlu1 %v1390_v28  ;;  %1430 = vmax.xlane.f32.xlu0 %v1429_v13 }
 0x137   :  { %1433 = vmax.xlane.f32.xlu1 %v1432_v34  ;;  %1451 = vmax.xlane.f32.xlu0 %v1450_v58 }
 0x13b   :  { %1472 = vmax.xlane.f32.xlu1 %v2818_v1  ;;  %1412 = vmax.xlane.f32.xlu0 %v2811_v50  ;;  %v3372_v1 = vlaneseq }
 0x13d   :  { %v1584_v39 = vand.u32 127, %v3372_v1 }
 0x13f   :  { %1394 = vmax.xlane.f32.xlu1 %v2845_v20  ;;  %1454 = vmax.xlane.f32.xlu0 %v2834_v36  ;;  %v1589_v50 = vadd.s32 4294967288, %v1584_v39  ;;  %v3373_v36 = vld [vmem:[#allocation8_spill] sm:$0xff] }
 0x140   :  { %v3067_v20 = vsub.s32 %v1584_v39, %v3373_v36 }
 0x143   :  { %1436 = vmax.xlane.f32.xlu1 %v2855_v56  ;;  %1475 = vmax.xlane.f32.xlu0 %v2837_v49  ;;  %v3064_v49 = vsub.s32 %v1589_v50, %v3373_v36 }
 0x147   :  { %1478 = vmax.xlane.f32.xlu1 %v2864_v47  ;;  %1415 = vmax.xlane.f32.xlu0 %v2848_v4  ;;  %v1596_v4 = vadd.s32 4294967280, %v1584_v39 }
 0x14b   :  { %1499 = vmax.xlane.f32.xlu1 %v2873_v3  ;;  %1457 = vmax.xlane.f32.xlu0 %v3371_v16 }
 0x14f   :  { %1418 = vmax.xlane.f32.xlu1 %v2892_v45  ;;  %1496 = vmax.xlane.f32.xlu0 %v2876_v19  ;;  %v1603_v45 = vadd.s32 4294967272, %v1584_v39 }
 0x153   :  { %1460 = vmax.xlane.f32.xlu1 %v2901_v29  ;;  %1397 = vmax.xlane.f32.xlu0 %v2884_v62  ;;  %v1610_v29 = vadd.s32 4294967264, %v1584_v39 }
 0x157   :  { %1502 = vmax.xlane.f32.xlu1 %v2912_v46  ;;  %1439 = vmax.xlane.f32.xlu0 %v2888_v5  ;;  %v3073_v5 = vsub.s32 %v1596_v4, %v3373_v36 }
 0x15b   :  { %1442 = vmax.xlane.f32.xlu1 %v2927_v37  ;;  %1481 = vmax.xlane.f32.xlu0 %v2904_v54  ;;  %v1617_v37 = vadd.s32 4294967256, %v1584_v39 }
 0x15f   :  { %1484 = vmax.xlane.f32.xlu1 %v2941_v26  ;;  %1421 = vmax.xlane.f32.xlu0 %v2916_v0  ;;  %v1624_v26 = vadd.s32 4294967248, %v1584_v39 }
 0x163   :  { %1445 = vmax.xlane.f32.xlu1 %v2930_v38  ;;  %1463 = vmax.xlane.f32.xlu0 %v2922_v48  ;;  %v3077_v48 = vsub.s32 %v1603_v45, %v3373_v36  ;;  %v3080_v38 = vsub.s32 %v1610_v29, %v3373_v36 }
 0x167   :  { %1487 = vmax.xlane.f32.xlu1 %v2947_v2  ;;  %1505 = vmax.xlane.f32.xlu0 %v2944_v6 }
 0x16b   :  { %1469 = vmax.xlane.f32.xlu1 %v2972_v24  ;;  %1466 = vmax.xlane.f32.xlu0 %v2969_v8 }
 0x16f   :  { %1511 = vmax.xlane.f32.xlu1 %v2978_v14  ;;  %1508 = vmax.xlane.f32.xlu0 %v2975_v22  ;;  %v3085_v22 = vsub.s32 %v1617_v37, %v3373_v36  ;;  %v1631_v14 = vadd.s32 4294967240, %v1584_v39 }
 0x173   :  { %1514 = vmax.xlane.f32.xlu1 %v1513_v17  ;;  %1490 = vmax.xlane.f32.xlu0 %v2981_v40 }
 0x177   :  { %1493 = vmax.xlane.f32.xlu0 %v2985_v35  ;;  %v3089_v35 = vsub.s32 %v1624_v26, %v3373_v36 }
 0x17b   :  { %1517 = vmax.xlane.f32.xlu0 %v1516_v57  ;;  %v3095_v57 = vsub.s32 %v1631_v14, %v3373_v36 }
 0x183   :  { %v1332_v56 = vpop.xlane.xlu1 %1331  ;;  %v1329_v47 = vpop.xlane.xlu0 %1328 }
 0x184   :  { %v1593_v3 = vrot.slane %v1332_v56, %v3064_v49  ;;  %v1588_v19 = vrot.slane %v1329_v47, %v3067_v20 }
 0x186   :  { %v1595_v62 = vsel %vm1594_vm1, %v1593_v3, %v1588_v19 }
 0x187   :  { %v1341_v54 = vpop.xlane.xlu1 %1340  ;;  %v1335_v46 = vpop.xlane.xlu0 %1334 }
 0x188   :  { %v1600_v0 = vrot.slane %v1335_v46, %v3073_v5  ;;  %v1614_v40 = vrot.slane %v1341_v54, %v3080_v38 }
 0x18a   :  { %v1602_v2 = vsel %vm1601_vm2, %v1600_v0, %v1595_v62 }
 0x18b   :  { %v1347_v6 = vpop.xlane.xlu1 %1346 }
 0x18c   :  { %v1338_v8 = vpop.xlane.xlu0 %1337  ;;  %v1628_v11 = vrot.slane %v1347_v6, %v3089_v35 }
 0x18d   :  { %v1607_v24 = vrot.slane %v1338_v8, %v3077_v48 }
 0x18f   :  { %v1353_v23 = vpop.xlane.xlu1 %1352  ;;  %v1609_v33 = vsel %vm1608_vm3, %v1607_v24, %v1602_v2 }
 0x190   :  { %v1616_v7 = vsel %vm1615_vm4, %v1614_v40, %v1609_v33  ;;  %v1641_v15 = vrot.slane %v1353_v23, %v3067_v20 }
 0x191   :  { %v1344_v42 = vpop.xlane.xlu0 %1343 }
 0x192   :  { %v1621_v17 = vrot.slane %v1344_v42, %v3085_v22 }
 0x193   :  { %v1359_v30 = vpop.xlane.xlu1 %1358 }
 0x194   :  { %v1623_v21 = vsel %vm1622_vm5, %v1621_v17, %v1616_v7  ;;  %v1650_v44 = vrot.slane %v1359_v30, %v3073_v5 }
 0x195   :  { %v1630_v32 = vsel %vm1629_vm6, %v1628_v11, %v1623_v21  ;;  %v1350_v60 = vpop.xlane.xlu0 %1349 }
 0x196   :  { %v1635_v52 = vrot.slane %v1350_v60, %v3095_v57 }
 0x197   :  { %v1365_v59 = vpop.xlane.xlu1 %1364 }
 0x198   :  { %v1637_v9 = vsel %vm1636_vm7, %v1635_v52, %v1630_v32  ;;  %v1660_v55 = vrot.slane %v1365_v59, %v3080_v38 }
 0x199   :  { %v1356_v18 = vpop.xlane.xlu0 %1355 }
 0x19a   :  { %v1645_v27 = vrot.slane %v1356_v18, %v3064_v49 }
 0x19b   :  { %v1371_v25 = vpop.xlane.xlu1 %1370 }
 0x19c   :  { %v1646_v10 = vsel %vm1594_vm1, %v1645_v27, %v1641_v15  ;;  %v1670_v13 = vrot.slane %v1371_v25, %v3089_v35 }
 0x19d   :  { %v1651_v51 = vsel %vm1601_vm2, %v1650_v44, %v1646_v10  ;;  %v1362_v43 = vpop.xlane.xlu0 %1361 }
 0x19e   :  { %v1655_v31 = vrot.slane %v1362_v43, %v3077_v48 }
 0x19f   :  { %v1377_v53 = vpop.xlane.xlu1 %1376 }
 0x1a0   :  { %v1656_v41 = vsel %vm1608_vm3, %v1655_v31, %v1651_v51  ;;  %v1680_v56 = vrot.slane %v1377_v53, %v3067_v20 }
 0x1a1   :  { %v1661_v63 = vsel %vm1615_vm4, %v1660_v55, %v1656_v41  ;;  %v1368_v28 = vpop.xlane.xlu0 %1367 }
 0x1a2   :  { %v1665_v61 = vrot.slane %v1368_v28, %v3085_v22 }
 0x1a3   :  { %v1383_v34 = vpop.xlane.xlu1 %1382 }
 0x1a4   :  { %v1666_v12 = vsel %vm1622_vm5, %v1665_v61, %v1661_v63  ;;  %v1689_v3 = vrot.slane %v1383_v34, %v3073_v5 }
 0x1a5   :  { %v1671_v58 = vsel %vm1629_vm6, %v1670_v13, %v1666_v12  ;;  %v1374_v16 = vpop.xlane.xlu0 %1373 }
 0x1a6   :  { %v1675_v1 = vrot.slane %v1374_v16, %v3095_v57 }
 0x1a7   :  { %v1389_v39 = vpop.xlane.xlu1 %1388 }
 0x1a8   :  { %v1676_v50 = vsel %vm1636_vm7, %v1675_v1, %v1671_v58  ;;  %v1699_v46 = vrot.slane %v1389_v39, %v3080_v38 }
 0x1a9   :  { %v1912_v36 = vsel %vm1911_vm8, %v1676_v50, %v1637_v9  ;;  %v1380_v4 = vpop.xlane.xlu0 %1379 }
 0x1aa   :  { %v1684_v47 = vrot.slane %v1380_v4, %v3064_v49 }
 0x1ac   :  { %v1685_v62 = vsel %vm1594_vm1, %v1684_v47, %v1680_v56 }
 0x1ad   :  { %v1690_v45 = vsel %vm1601_vm2, %v1689_v3, %v1685_v62 }
 0x1ae   :  { %v1404_v19 = vpop.xlane.xlu1 %1403 }
 0x1af   :  { %v1723_v2 = vrot.slane %v1404_v19, %v3064_v49 }
 0x1b0   :  { %v1386_v29 = vpop.xlane.xlu0 %1385 }
 0x1b1   :  { %v1694_v54 = vrot.slane %v1386_v29, %v3077_v48 }
 0x1b3   :  { %v1695_v37 = vsel %vm1608_vm3, %v1694_v54, %v1690_v45 }
 0x1b4   :  { %v1425_v0 = vpop.xlane.xlu1 %1424  ;;  %v1401_v26 = vpop.xlane.xlu0 %1400  ;;  %v1700_v6 = vsel %vm1615_vm4, %v1699_v46, %v1695_v37 }
 0x1b5   :  { %v1719_v8 = vrot.slane %v1401_v26, %v3067_v20  ;;  %v1758_v30 = vrot.slane %v1425_v0, %v3067_v20 }
 0x1b7   :  { %v1724_v14 = vsel %vm1594_vm1, %v1723_v2, %v1719_v8 }
 0x1b8   :  { %v1410_v24 = vpop.xlane.xlu1 %1409  ;;  %v1407_v23 = vpop.xlane.xlu0 %1406 }
 0x1b9   :  { %v1733_v40 = vrot.slane %v1410_v24, %v3077_v48  ;;  %v1728_v33 = vrot.slane %v1407_v23, %v3073_v5 }
 0x1bb   :  { %v1729_v42 = vsel %vm1601_vm2, %v1728_v33, %v1724_v14 }
 0x1bc   :  { %v3131_v7 = vpop.xlane.xlu1 %1448  ;;  %v1428_v17 = vpop.xlane.xlu0 %1427  ;;  %v1734_v11 = vsel %vm1608_vm3, %v1733_v40, %v1729_v42 }
 0x1bd   :  { %v1762_v21 = vrot.slane %v1428_v17, %v3064_v49 }
 0x1bf   :  { %v1763_v60 = vsel %vm1594_vm1, %v1762_v21, %v1758_v30 }
 0x1c0   :  { %v1392_v32 = vpop.xlane.xlu1 %1391  ;;  %v1431_v52 = vpop.xlane.xlu0 %1430 }
 0x1c1   :  { %v1767_v59 = vrot.slane %v1431_v52, %v3073_v5  ;;  %v1704_v61 = vrot.slane %v1392_v32, %v3085_v22 }
 0x1c3   :  { %v1768_v18 = vsel %vm1601_vm2, %v1767_v59, %v1763_v60  ;;  %v1705_v58 = vsel %vm1622_vm5, %v1704_v61, %v1700_v6 }
 0x1c4   :  { %v1434_v9 = vpop.xlane.xlu1 %1433  ;;  %v3140_v15 = vpop.xlane.xlu0 %1451 }
 0x1c5   :  { %v1772_v62 = vrot.slane %v1434_v9, %v3077_v48 }
 0x1c7   :  { %v1773_v6 = vsel %vm1608_vm3, %v1772_v62, %v1768_v18  ;;  %v1801_v18 = vrot.slane %v3140_v15, %v3064_v49 }
 0x1c8   :  { %v3142_v27 = vpop.xlane.xlu1 %1472  ;;  %v1413_v44 = vpop.xlane.xlu0 %1412 }
 0x1c9   :  { %v1738_v3 = vrot.slane %v1413_v44, %v3080_v38 }
 0x1cc   :  { %v1395_v25 = vpop.xlane.xlu1 %1394  ;;  %v3144_v10 = vpop.xlane.xlu0 %1454 }
 0x1cd   :  { %v1709_v13 = vrot.slane %v1395_v25, %v3089_v35  ;;  %v1806_v44 = vrot.slane %v3144_v10, %v3073_v5  ;;  %v1797_v25 = vrot.slane %v3131_v7, %v3067_v20 }
 0x1cf   :  { %v1710_v1 = vsel %vm1629_vm6, %v1709_v13, %v1705_v58  ;;  %v1802_v13 = vsel %vm1594_vm1, %v1801_v18, %v1797_v25 }
 0x1d0   :  { %v1437_v51 = vpop.xlane.xlu1 %1436  ;;  %v3146_v43 = vpop.xlane.xlu0 %1475  ;;  %v1807_v7 = vsel %vm1601_vm2, %v1806_v44, %v1802_v13 }
 0x1d1   :  { %v1777_v29 = vrot.slane %v1437_v51, %v3080_v38  ;;  %v1840_v51 = vrot.slane %v3146_v43, %v3064_v49 }
 0x1d3   :  { %v1778_v24 = vsel %vm1615_vm4, %v1777_v29, %v1773_v6 }
 0x1d4   :  { %v3148_v31 = vpop.xlane.xlu1 %1478  ;;  %v1416_v55 = vpop.xlane.xlu0 %1415 }
 0x1d5   :  { %v1743_v45 = vrot.slane %v1416_v55, %v3085_v22  ;;  %v1845_v15 = vrot.slane %v3148_v31, %v3073_v5 }
 0x1d8   :  { %v3150_v53 = vpop.xlane.xlu1 %1499  ;;  %v3152_v41 = vpop.xlane.xlu0 %1457 }
 0x1dc   :  { %v1419_v63 = vpop.xlane.xlu1 %1418  ;;  %v3154_v28 = vpop.xlane.xlu0 %1496 }
 0x1dd   :  { %v1748_v54 = vrot.slane %v1419_v63, %v3089_v35  ;;  %v1811_v63 = vrot.slane %v3152_v41, %v3077_v48  ;;  %v1875_v43 = vrot.slane %v3154_v28, %v3067_v20 }
 0x1e0   :  { %v3158_v34 = vpop.xlane.xlu1 %1460  ;;  %v1398_v12 = vpop.xlane.xlu0 %1397 }
 0x1e1   :  { %v1714_v16 = vrot.slane %v1398_v12, %v3095_v57  ;;  %v1836_v12 = vrot.slane %v3142_v27, %v3067_v20  ;;  %v1816_v10 = vrot.slane %v3158_v34, %v3080_v38  ;;  %v1879_v34 = vrot.slane %v3150_v53, %v3064_v49 }
 0x1e3   :  { %v1715_v50 = vsel %vm1636_vm7, %v1714_v16, %v1710_v1  ;;  %v1841_v41 = vsel %vm1594_vm1, %v1840_v51, %v1836_v12 }
 0x1e4   :  { %v3163_v39 = vpop.xlane.xlu1 %1502  ;;  %v1914_v4 = vsel %vm1913_vm9, %v1715_v50, %v1912_v36  ;;  %v1440_v56 = vpop.xlane.xlu0 %1439  ;;  %v1739_v36 = vsel %vm1615_vm4, %v1738_v3, %v1734_v11  ;;  %v1812_v50 = vsel %vm1608_vm3, %v1811_v63, %v1807_v7 }
 0x1e5   :  { %v1782_v0 = vrot.slane %v1440_v56, %v3085_v22  ;;  %v1744_v2 = vsel %vm1622_vm5, %v1743_v45, %v1739_v36  ;;  %v1884_v16 = vrot.slane %v3163_v39, %v3073_v5  ;;  %v1817_v5 = vsel %vm1615_vm4, %v1816_v10, %v1812_v50 }
 0x1e6   :  { %v1749_v14 = vsel %vm1629_vm6, %v1748_v54, %v1744_v2 }
 0x1e7   :  { %v1783_v23 = vsel %vm1622_vm5, %v1782_v0, %v1778_v24 }
 0x1e8   :  { %v1443_v47 = vpop.xlane.xlu1 %1442  ;;  %v3167_v19 = vpop.xlane.xlu0 %1481 }
 0x1e9   :  { %v1787_v37 = vrot.slane %v1443_v47, %v3089_v35  ;;  %v1850_v27 = vrot.slane %v3167_v19, %v3077_v48  ;;  %v1880_v47 = vsel %vm1594_vm1, %v1879_v34, %v1875_v43 }
 0x1ea   :  { %v1885_v62 = vsel %vm1601_vm2, %v1884_v16, %v1880_v47 }
 0x1eb   :  { %v1788_v17 = vsel %vm1629_vm6, %v1787_v37, %v1783_v23 }
 0x1ec   :  { %v3173_v46 = vpop.xlane.xlu1 %1484  ;;  %v1422_v26 = vpop.xlane.xlu0 %1421 }
 0x1ed   :  { %v1753_v8 = vrot.slane %v1422_v26, %v3095_v57  ;;  %v1855_v20 = vrot.slane %v3173_v46, %v3080_v38 }
 0x1ef   :  { %v1754_v33 = vsel %vm1636_vm7, %v1753_v8, %v1749_v14 }
 0x1f0   :  { %v1446_v40 = vpop.xlane.xlu1 %1445  ;;  %v1916_v11 = vsel %vm1915_vm10, %v1754_v33, %v1914_v4  ;;  %v1464_v30 = vpop.xlane.xlu0 %1463  ;;  %v1846_v4 = vsel %vm1601_vm2, %v1845_v15, %v1841_v41 }
 0x1f1   :  { %v1792_v42 = vrot.slane %v1446_v40, %v3095_v57  ;;  %v1821_v58 = vrot.slane %v1464_v30, %v3085_v22 }
 0x1f3   :  { %v1793_v21 = vsel %vm1636_vm7, %v1792_v42, %v1788_v17  ;;  %v1822_v3 = vsel %vm1622_vm5, %v1821_v58, %v1817_v5 }
 0x1f4   :  { %v1918_v32 = vsel %vm1917_vm11, %v1793_v21, %v1916_v11  ;;  %v1488_v60 = vpop.xlane.xlu1 %1487  ;;  %v1506_v52 = vpop.xlane.xlu0 %1505 }
 0x1f5   :  { %v1889_v28 = vrot.slane %v1506_v52, %v3077_v48  ;;  %v1860_v39 = vrot.slane %v1488_v60, %v3085_v22  ;;  %v1851_v48 = vsel %vm1608_vm3, %v1850_v27, %v1846_v4 }
 0x1f6   :  { %v1856_v54 = vsel %vm1615_vm4, %v1855_v20, %v1851_v48 }
 0x1f7   :  { %v1861_v36 = vsel %vm1622_vm5, %v1860_v39, %v1856_v54 }
 0x1f8   :  { %v1470_v59 = vpop.xlane.xlu1 %1469  ;;  %v1467_v9 = vpop.xlane.xlu0 %1466 }
 0x1f9   :  { %v1826_v31 = vrot.slane %v1467_v9, %v3089_v35  ;;  %v1831_v49 = vrot.slane %v1470_v59, %v3095_v57 }
 0x1fb   :  { %v1827_v45 = vsel %vm1629_vm6, %v1826_v31, %v1822_v3 }
 0x1fc   :  { %v1509_v55 = vpop.xlane.xlu0 %1508  ;;  %v1512_v61 = vpop.xlane.xlu1 %1511  ;;  %v1832_v6 = vsel %vm1636_vm7, %v1831_v49, %v1827_v45 }
 0x1fd   :  { %v1894_v56 = vrot.slane %v1509_v55, %v3080_v38  ;;  %v1890_v38 = vsel %vm1608_vm3, %v1889_v28, %v1885_v62  ;;  %v1899_v46 = vrot.slane %v1512_v61, %v3085_v22  ;;  %v1920_v23 = vsel %vm1919_vm12, %v1832_v6, %v1918_v32 }
 0x1ff   :  { %v1895_v37 = vsel %vm1615_vm4, %v1894_v56, %v1890_v38 }
 0x200   :  { %v1491_v1 = vpop.xlane.xlu0 %1490  ;;  %v1515_v53 = vpop.xlane.xlu1 %1514  ;;  %v1900_v22 = vsel %vm1622_vm5, %v1899_v46, %v1895_v37 }
 0x201   :  { %v1865_v19 = vrot.slane %v1491_v1, %v3089_v35  ;;  %v1904_v26 = vrot.slane %v1515_v53, %v3089_v35 }
 0x203   :  { %v1866_v2 = vsel %vm1629_vm6, %v1865_v19, %v1861_v36  ;;  %v1905_v40 = vsel %vm1629_vm6, %v1904_v26, %v1900_v22 }
 0x204   :  { %v1494_v29 = vpop.xlane.xlu0 %1493 }
 0x205   :  { %v1870_v0 = vrot.slane %v1494_v29, %v3095_v57 }
 0x207   :  { %v1871_v8 = vsel %vm1636_vm7, %v1870_v0, %v1866_v2 }
 0x208   :  { %v1518_v24 = vpop.xlane.xlu0 %1517  ;;  %v1922_v33 = vsel %vm1921_vm13, %v1871_v8, %v1920_v23 }
 0x209   :  { %v1909_v14 = vrot.slane %v1518_v24, %v3095_v57 }
 0x20b   :  { %v1910_v35 = vsel %vm1636_vm7, %v1909_v14, %v1905_v40 }
 0x20c   :  { %v1924_v42 = vsel %vm1923_vm14, %v1910_v35, %v1922_v33 }
 0x20d   :  { %1927 = vst.msk [vmem:[#allocation5] sm:$0xff] %vm1926_vm15, %v1924_v42 }
 0x20e   :  { %1989 = shalt.err (!%p1986_p12)
}
 0x20f   :  { %s1990_s2 = scalar_lea.hbm %s3259_s1, 128 }
 0x210   :  { %p1991_p13 = scmp.ne.s32.totalorder %s3259_s1, %s1990_s2  ;;  %p1994_p0 = scmp.lt.u32.totalorder %s1990_s2, %s3259_s1 }
 0x212   :  { %p1996_p1 = pnand %p1994_p0, %p1991_p13 }
 0x214   :  { %1999 = shalt.err (!%p1996_p1)
}
 0x215   :  { %1937 = dma.vmem_to_hbm [thread:$0]  %s1935_s27, 128, %s3259_s1, [#allocation4]  }
 0x216   :  { %2002 = dma.done.wait [#allocation4], 128  }
 0x217   :  { %2003 = vsyncadd [#allocation4], 4294967168 }
 0x218   :  { %1941 = vsyncpa [#allocation3], 1 }
 0x219   :  { %1942 = vsyncpa [#allocation4], 1 }

</bundles_post_ra>
